<compile_context>
chip_gen: v7x
topology: tpu7x:2x2x1
jax: 0.10.0
libtpu: 0.0.40
codegen_flags: <defaults>
</compile_context>

<pallas_src>
import functools

import jax
import jax.numpy as jnp
from jax.experimental import pallas as pl
from jax.experimental.pallas import tpu as pltpu


def _guided_filter_kernel(I_ref, p_ref, bh_ref, bwd_ref, inv_n_ref, out_ref,
                          *, eps: float):
    I = I_ref[...].astype(jnp.float32)           # (H, L) lane-packed planes
    p = p_ref[...].astype(jnp.float32)
    BH = bh_ref[...]                              # (H, H) resident band matrix
    BWD = bwd_ref[...]                            # (L, L) resident block-diag band
    inv_N = inv_n_ref[...]                        # (H, L) resident 1/window-count
    L = I.shape[1]

    def w_pass(x):  # per-plane box-sum along W (block-diag keeps planes separate)
        return jnp.dot(x, BWD, preferred_element_type=jnp.float32)

    # ---- stage 1: box means of I, p, I*p, I*I (one fat H-pass matmul) ----
    s1 = jnp.concatenate([I, p, I * p, I * I], axis=1)            # (H, 4L)
    t1 = jnp.dot(BH, s1, preferred_element_type=jnp.float32)      # (H, 4L)
    mean_I = w_pass(t1[:, 0 * L:1 * L]) * inv_N
    mean_p = w_pass(t1[:, 1 * L:2 * L]) * inv_N
    mean_Ip = w_pass(t1[:, 2 * L:3 * L]) * inv_N
    mean_II = w_pass(t1[:, 3 * L:4 * L]) * inv_N

    cov_Ip = mean_Ip - mean_I * mean_p
    var_I = mean_II - mean_I * mean_I
    a = cov_Ip / (var_I + eps)
    b = mean_p - a * mean_I

    # ---- stage 2: box means of a, b ----
    s2 = jnp.concatenate([a, b], axis=1)                          # (H, 2L)
    t2 = jnp.dot(BH, s2, preferred_element_type=jnp.float32)
    mean_a = w_pass(t2[:, 0 * L:1 * L]) * inv_N
    mean_b = w_pass(t2[:, 1 * L:2 * L]) * inv_N

    out_ref[...] = (mean_a * I + mean_b).astype(out_ref.dtype)


def _choose_c_tile(planes: int, W: int, max_lanes: int = 512) -> int:
    """Planes packed per grid step.

    Prefer the smallest divisor of `planes` whose packed lane width C_TILE*W
    is a multiple of 128 (dense vregs, unmasked stores) and stays modest so
    BWD (L x L) is small; keeping C_TILE minimal preserves >= 2 parallel grid
    steps for megacore (v7x) whenever the plane count allows it.
    """
    divisors = [d for d in range(1, planes + 1) if planes % d == 0]
    dense = [d for d in divisors if (d * W) % 128 == 0 and d * W <= max_lanes]
    if dense:
        return dense[0]
    fitting = [d for d in divisors if d * W <= max_lanes]
    return fitting[-1] if fitting else 1


def guided_filter(I, p, *, r: int, eps: float, c_tile: int | None = None):
    """Pallas GuidedFilter forward.  I, p: (B, C, H, W) float32 in [0, 1]."""
    assert I.shape == p.shape and I.ndim == 4
    B, C, H, W = I.shape
    planes = B * C
    if c_tile is None:
        c_tile = _choose_c_tile(planes, W)
    assert planes % c_tile == 0
    G = planes // c_tile
    L = c_tile * W
    f32 = jnp.float32

    # ---- grid-invariant operands, built once (constant index_map => DMA'd
    # once and kept VMEM-resident across all grid steps) ----
    ih = jnp.arange(H)
    iw = jnp.arange(W)
    BH = (jnp.abs(ih[:, None] - ih[None, :]) <= r).astype(f32)        # (H, H)
    BW = (jnp.abs(iw[:, None] - iw[None, :]) <= r).astype(f32)        # (W, W)
    BWD = jnp.kron(jnp.eye(c_tile, dtype=f32), BW)                    # (L, L)

    # inv_N = 1 / boxsum(ones); separable window counts (no in-kernel matmuls)
    ch = (jnp.minimum(ih + r, H - 1) - jnp.maximum(ih - r, 0) + 1).astype(f32)
    cw = (jnp.minimum(iw + r, W - 1) - jnp.maximum(iw - r, 0) + 1).astype(f32)
    inv_N = jnp.tile(1.0 / (ch[:, None] * cw[None, :]), (1, c_tile))  # (H, L)

    # ---- wrapper-side layout plumbing: lane-pack c_tile planes per step ----
    def pack(x):
        return (x.reshape(G, c_tile, H, W)
                 .transpose(0, 2, 1, 3)
                 .reshape(G, H, L))

    I_packed = pack(I)
    p_packed = pack(p)

    plane_spec = pl.BlockSpec((None, H, L), lambda g: (g, 0, 0))

    def const_spec(shape):
        return pl.BlockSpec(shape, lambda g: (0, 0))

    kernel = functools.partial(_guided_filter_kernel, eps=eps)
    out_packed = pl.pallas_call(
        kernel,
        out_shape=jax.ShapeDtypeStruct((G, H, L), I.dtype),
        grid=(G,),
        in_specs=[plane_spec, plane_spec,
                  const_spec((H, H)), const_spec((L, L)), const_spec((H, L))],
        out_specs=plane_spec,
        compiler_params=pltpu.CompilerParams(
            dimension_semantics=("parallel",),
            vmem_limit_bytes=32 * 1024 * 1024),
    )(I_packed, p_packed, BH, BWD, inv_N)

    return (out_packed.reshape(G, H, c_tile, W)
                      .transpose(0, 2, 1, 3)
                      .reshape(B, C, H, W))


# ---------------- pure-JAX reference (for correctness check) ----------------
def _boxsum_ref(x, r):
    k = 2 * r + 1
    return jax.lax.reduce_window(
        x, 0.0, jax.lax.add,
        window_dimensions=(1, 1, k, k),
        window_strides=(1, 1, 1, 1),
        padding=[(0, 0), (0, 0), (r, r), (r, r)])


def _guided_filter_ref(I, p, r, eps):
    N = _boxsum_ref(jnp.ones_like(p), r)
    mean_I = _boxsum_ref(I, r) / N
    mean_p = _boxsum_ref(p, r) / N
    mean_Ip = _boxsum_ref(I * p, r) / N
    cov_Ip = mean_Ip - mean_I * mean_p
    mean_II = _boxsum_ref(I * I, r) / N
    var_I = mean_II - mean_I * mean_I
    a = cov_Ip / (var_I + eps)
    b = mean_p - a * mean_I
    mean_a = _boxsum_ref(a, r) / N
    mean_b = _boxsum_ref(b, r) / N
    return mean_a * I + mean_b


if __name__ == "__main__":
    B, C, H, W = 2, 4, 16, 16
    r, eps = 2, 1e-2  # GuidedFilter(r=2, eps=1e-2); module has no learnable params

    key = jax.random.PRNGKey(0)
    k1, k2 = jax.random.split(key)
    I = jax.random.uniform(k1, (B, C, H, W), dtype=jnp.float32)  # guidance, [0,1]
    p = jax.random.uniform(k2, (B, C, H, W), dtype=jnp.float32)  # input,    [0,1]

    gf = jax.jit(functools.partial(guided_filter, r=r, eps=eps))
    out = jax.block_until_ready(gf(I, p))

    ref = jax.block_until_ready(_guided_filter_ref(I, p, r, eps))
    if not jnp.allclose(out, ref, atol=1e-4, rtol=1e-4):
        raise AssertionError("Pallas GuidedFilter output mismatch vs reference")

    print("KERNEL_OK")
</pallas_src>

<mosaic_0001>
module attributes {stable_mosaic.version = 11 : i64} {
  func.func @_guided_filter_kernel(%arg0: i32, %arg1: memref<1x16x128xf32, #tpu.memory_space<vmem>>, %arg2: memref<1x16x128xf32, #tpu.memory_space<vmem>>, %arg3: memref<16x16xf32, #tpu.memory_space<vmem>>, %arg4: memref<128x128xf32, #tpu.memory_space<vmem>>, %arg5: memref<16x128xf32, #tpu.memory_space<vmem>>, %arg6: memref<1x16x128xf32, #tpu.memory_space<vmem>>) attributes {dimension_semantics = [#tpu.dimension_semantics<parallel>], iteration_bounds = array<i64: 1>, scalar_prefetch = 0 : i64, scratch_operands = 0 : i64, tpu.core_type = #tpu.core_type<tc>, window_params = [{transform_indices = @transform_0, window_bounds = array<i64: 1, 16, 128>}, {transform_indices = @transform_1, window_bounds = array<i64: 1, 16, 128>}, {pipeline_mode = #tpu.pipeline_mode<synchronous>, transform_indices = @transform_2, window_bounds = array<i64: 16, 16>}, {pipeline_mode = #tpu.pipeline_mode<synchronous>, transform_indices = @transform_3, window_bounds = array<i64: 128, 128>}, {pipeline_mode = #tpu.pipeline_mode<synchronous>, transform_indices = @transform_4, window_bounds = array<i64: 16, 128>}, {transform_indices = @transform_5, window_bounds = array<i64: 1, 16, 128>}]} {
    %c0 = arith.constant 0 : index
    %c0_0 = arith.constant 0 : index
    %c0_1 = arith.constant 0 : index
    %0 = vector.load %arg1[%c0, %c0_0, %c0_1] : memref<1x16x128xf32, #tpu.memory_space<vmem>>, vector<1x16x128xf32>
    %1 = vector.shape_cast %0 : vector<1x16x128xf32> to vector<16x128xf32>
    %c0_2 = arith.constant 0 : index
    %c0_3 = arith.constant 0 : index
    %c0_4 = arith.constant 0 : index
    %2 = vector.load %arg2[%c0_2, %c0_3, %c0_4] : memref<1x16x128xf32, #tpu.memory_space<vmem>>, vector<1x16x128xf32>
    %3 = vector.shape_cast %2 : vector<1x16x128xf32> to vector<16x128xf32>
    %c0_5 = arith.constant 0 : index
    %c0_6 = arith.constant 0 : index
    %4 = vector.load %arg3[%c0_5, %c0_6] : memref<16x16xf32, #tpu.memory_space<vmem>>, vector<16x16xf32>
    %c0_7 = arith.constant 0 : index
    %c0_8 = arith.constant 0 : index
    %5 = vector.load %arg4[%c0_7, %c0_8] : memref<128x128xf32, #tpu.memory_space<vmem>>, vector<128x128xf32>
    %c0_9 = arith.constant 0 : index
    %c0_10 = arith.constant 0 : index
    %6 = vector.load %arg5[%c0_9, %c0_10] : memref<16x128xf32, #tpu.memory_space<vmem>>, vector<16x128xf32>
    %7 = arith.mulf %1, %3 : vector<16x128xf32>
    %8 = arith.mulf %1, %1 : vector<16x128xf32>
    %9 = tpu.concatenate %1, %3, %7, %8 in 1 : vector<16x128xf32>, vector<16x128xf32>, vector<16x128xf32>, vector<16x128xf32> -> vector<16x512xf32>
    %cst = arith.constant dense<0.000000e+00> : vector<16x512xf32>
    %10 = tpu.matmul %4, %9, %cst {dimension_numbers = #tpu.dot_dimension_numbers<[1], [0], [0], [1], [0, 0, 1, 1], [], []>} : vector<16x16xf32>, vector<16x512xf32>, vector<16x512xf32> -> vector<16x512xf32>
    %11 = vector.extract_strided_slice %10 {offsets = [0, 0], sizes = [16, 128], strides = [1, 1]} : vector<16x512xf32> to vector<16x128xf32>
    %cst_11 = arith.constant dense<0.000000e+00> : vector<16x128xf32>
    %12 = tpu.matmul %11, %5, %cst_11 {dimension_numbers = #tpu.dot_dimension_numbers<[1], [0], [0], [1], [0, 0, 1, 1], [], []>} : vector<16x128xf32>, vector<128x128xf32>, vector<16x128xf32> -> vector<16x128xf32>
    %13 = arith.mulf %12, %6 : vector<16x128xf32>
    %14 = vector.extract_strided_slice %10 {offsets = [0, 128], sizes = [16, 128], strides = [1, 1]} : vector<16x512xf32> to vector<16x128xf32>
    %cst_12 = arith.constant dense<0.000000e+00> : vector<16x128xf32>
    %15 = tpu.matmul %14, %5, %cst_12 {dimension_numbers = #tpu.dot_dimension_numbers<[1], [0], [0], [1], [0, 0, 1, 1], [], []>} : vector<16x128xf32>, vector<128x128xf32>, vector<16x128xf32> -> vector<16x128xf32>
    %16 = arith.mulf %15, %6 : vector<16x128xf32>
    %17 = vector.extract_strided_slice %10 {offsets = [0, 256], sizes = [16, 128], strides = [1, 1]} : vector<16x512xf32> to vector<16x128xf32>
    %cst_13 = arith.constant dense<0.000000e+00> : vector<16x128xf32>
    %18 = tpu.matmul %17, %5, %cst_13 {dimension_numbers = #tpu.dot_dimension_numbers<[1], [0], [0], [1], [0, 0, 1, 1], [], []>} : vector<16x128xf32>, vector<128x128xf32>, vector<16x128xf32> -> vector<16x128xf32>
    %19 = arith.mulf %18, %6 : vector<16x128xf32>
    %20 = vector.extract_strided_slice %10 {offsets = [0, 384], sizes = [16, 128], strides = [1, 1]} : vector<16x512xf32> to vector<16x128xf32>
    %cst_14 = arith.constant dense<0.000000e+00> : vector<16x128xf32>
    %21 = tpu.matmul %20, %5, %cst_14 {dimension_numbers = #tpu.dot_dimension_numbers<[1], [0], [0], [1], [0, 0, 1, 1], [], []>} : vector<16x128xf32>, vector<128x128xf32>, vector<16x128xf32> -> vector<16x128xf32>
    %22 = arith.mulf %21, %6 : vector<16x128xf32>
    %23 = arith.mulf %13, %16 : vector<16x128xf32>
    %24 = arith.subf %19, %23 : vector<16x128xf32>
    %25 = arith.mulf %13, %13 : vector<16x128xf32>
    %26 = arith.subf %22, %25 : vector<16x128xf32>
    %cst_15 = arith.constant 0.00999999977 : f32
    %27 = vector.broadcast %cst_15 : f32 to vector<16x128xf32>
    %28 = arith.addf %26, %27 : vector<16x128xf32>
    %29 = arith.divf %24, %28 : vector<16x128xf32>
    %30 = arith.mulf %29, %13 : vector<16x128xf32>
    %31 = arith.subf %16, %30 : vector<16x128xf32>
    %32 = tpu.concatenate %29, %31 in 1 : vector<16x128xf32>, vector<16x128xf32> -> vector<16x256xf32>
    %cst_16 = arith.constant dense<0.000000e+00> : vector<16x256xf32>
    %33 = tpu.matmul %4, %32, %cst_16 {dimension_numbers = #tpu.dot_dimension_numbers<[1], [0], [0], [1], [0, 0, 1, 1], [], []>} : vector<16x16xf32>, vector<16x256xf32>, vector<16x256xf32> -> vector<16x256xf32>
    %34 = vector.extract_strided_slice %33 {offsets = [0, 0], sizes = [16, 128], strides = [1, 1]} : vector<16x256xf32> to vector<16x128xf32>
    %cst_17 = arith.constant dense<0.000000e+00> : vector<16x128xf32>
    %35 = tpu.matmul %34, %5, %cst_17 {dimension_numbers = #tpu.dot_dimension_numbers<[1], [0], [0], [1], [0, 0, 1, 1], [], []>} : vector<16x128xf32>, vector<128x128xf32>, vector<16x128xf32> -> vector<16x128xf32>
    %36 = arith.mulf %35, %6 : vector<16x128xf32>
    %37 = vector.extract_strided_slice %33 {offsets = [0, 128], sizes = [16, 128], strides = [1, 1]} : vector<16x256xf32> to vector<16x128xf32>
    %cst_18 = arith.constant dense<0.000000e+00> : vector<16x128xf32>
    %38 = tpu.matmul %37, %5, %cst_18 {dimension_numbers = #tpu.dot_dimension_numbers<[1], [0], [0], [1], [0, 0, 1, 1], [], []>} : vector<16x128xf32>, vector<128x128xf32>, vector<16x128xf32> -> vector<16x128xf32>
    %39 = arith.mulf %38, %6 : vector<16x128xf32>
    %40 = arith.mulf %36, %1 : vector<16x128xf32>
    %41 = arith.addf %40, %39 : vector<16x128xf32>
    %c0_19 = arith.constant 0 : index
    %c0_20 = arith.constant 0 : index
    %c0_21 = arith.constant 0 : index
    %42 = vector.load %arg6[%c0_19, %c0_20, %c0_21] : memref<1x16x128xf32, #tpu.memory_space<vmem>>, vector<1x16x128xf32>
    %43 = vector.shape_cast %42 : vector<1x16x128xf32> to vector<16x128xf32>
    %44 = vector.shape_cast %41 : vector<16x128xf32> to vector<1x16x128xf32>
    tpu.vector_store %arg6[%c0_19, %c0_20, %c0_21], %44 {strides = array<i32>} : memref<1x16x128xf32, #tpu.memory_space<vmem>>, vector<1x16x128xf32>,
    return
  }
  func.func @transform_0(%arg0: i32) -> (i32, i32, i32) {
    %c0_i32 = arith.constant 0 : i32
    %c0_i32_0 = arith.constant 0 : i32
    %c0_i32_1 = arith.constant 0 : i32
    return %arg0, %c0_i32, %c0_i32_0 : i32, i32, i32
  }
  func.func @transform_1(%arg0: i32) -> (i32, i32, i32) {
    %c0_i32 = arith.constant 0 : i32
    %c0_i32_0 = arith.constant 0 : i32
    %c0_i32_1 = arith.constant 0 : i32
    return %arg0, %c0_i32, %c0_i32_0 : i32, i32, i32
  }
  func.func @transform_2(%arg0: i32) -> (i32, i32) {
    %c0_i32 = arith.constant 0 : i32
    %c0_i32_0 = arith.constant 0 : i32
    %c0_i32_1 = arith.constant 0 : i32
    return %c0_i32, %c0_i32_0 : i32, i32
  }
  func.func @transform_3(%arg0: i32) -> (i32, i32) {
    %c0_i32 = arith.constant 0 : i32
    %c0_i32_0 = arith.constant 0 : i32
    %c0_i32_1 = arith.constant 0 : i32
    return %c0_i32, %c0_i32_0 : i32, i32
  }
  func.func @transform_4(%arg0: i32) -> (i32, i32) {
    %c0_i32 = arith.constant 0 : i32
    %c0_i32_0 = arith.constant 0 : i32
    %c0_i32_1 = arith.constant 0 : i32
    return %c0_i32, %c0_i32_0 : i32, i32
  }
  func.func @transform_5(%arg0: i32) -> (i32, i32, i32) {
    %c0_i32 = arith.constant 0 : i32
    %c0_i32_0 = arith.constant 0 : i32
    %c0_i32_1 = arith.constant 0 : i32
    return %arg0, %c0_i32, %c0_i32_0 : i32, i32, i32
  }
}

</mosaic_0001>

<bundles_post_ra>
// kernel: tile.9
= control target key start
LH: loop header
LB: loop body
LE: loop exit
PB: predicated region body
PF: predicated region fallthrough
CT: control target
= control target key end

     0   :  { %vm4_vm0 = vcmask 1047556   ;;  %s209_s14 = smov 96   ;;  %s210_s19 = smov 112   ;;  %vm6_vm1 = vcmask 130048   ;;  %vm25_vm2 = vcmask 1048448   ;;  %vm46_vm3 = vcmask 917248   ;;  %s388_s0 = inlined_call_operand.vmem [shape: f32[16,8,16], index: 0, kind: input, shape index: {}]   ;;  %s389_s1 = inlined_call_operand.vmem [shape: f32[16,128], index: 1, kind: output, shape index: {}]  }
   0x1   :  { %v172_v0 = vld [vmem:[%s388_s0 + $0x6] ss:$8 sm:$0xf]   ;;  %v167_v3 = vld [vmem:[%s388_s0 + $0x7] ss:$8 sm:$0xf]  }
   0x2   :  { %v173_v1 = vld [vmem:[%s388_s0 + $0x6] ss:$8 sm:$0xf0]   ;;  %v168_v4 = vld [vmem:[%s388_s0 + $0x7] ss:$8 sm:$0xf0]  }
   0x3   :  { %v43_v2 = vsel %vm4_vm0, %v173_v1, %v172_v0  ;;  %v22_v5 = vsel %vm4_vm0, %v168_v4, %v167_v3  ;;  %v174_v6 = vld [vmem:[%s388_s0 + $0x46] ss:$8 sm:$0xf]   ;;  %v169_v9 = vld [vmem:[%s388_s0 + $0x47] ss:$8 sm:$0xf]  }
   0x4   :  { %44 = vrot.lane.b32.xlu1 %v43_v2, %s209_s14  ;;  %v175_v7 = vld [vmem:[%s388_s0 + $0x46] ss:$8 sm:$0xf0]   ;;  %23 = vrot.lane.b32.xlu0 %v22_v5, %s210_s19  ;;  %v170_v10 = vld [vmem:[%s388_s0 + $0x47] ss:$8 sm:$0xf0]  }
   0x5   :  { %v53_v8 = vsel %vm4_vm0, %v175_v7, %v174_v6  ;;  %v32_v11 = vsel %vm4_vm0, %v170_v10, %v169_v9  ;;  %v179_v12 = vld [vmem:[%s388_s0 + $0x45] ss:$8 sm:$0xf]   ;;  %v184_v18 = vld [vmem:[%s388_s0 + $0x44] ss:$8 sm:$0xf]  }
   0x6   :  { %v180_v13 = vld [vmem:[%s388_s0 + $0x45] ss:$8 sm:$0xf0]   ;;  %v185_v19 = vld [vmem:[%s388_s0 + $0x44] ss:$8 sm:$0xf0]  }
   0x7   :  { %v177_v14 = vld [vmem:[%s388_s0 + $0x5] ss:$8 sm:$0xf]   ;;  %v74_v16 = vsel %vm4_vm0, %v180_v13, %v179_v12  ;;  %v182_v20 = vld [vmem:[%s388_s0 + $0x4] ss:$8 sm:$0xf]   ;;  %v95_v22 = vsel %vm4_vm0, %v185_v19, %v184_v18 }
   0x8   :  { %54 = vrot.lane.b32.xlu1 %v53_v8, %s209_s14  ;;  %v178_v15 = vld [vmem:[%s388_s0 + $0x5] ss:$8 sm:$0xf0]   ;;  %33 = vrot.lane.b32.xlu0 %v32_v11, %s210_s19  ;;  %v183_v21 = vld [vmem:[%s388_s0 + $0x4] ss:$8 sm:$0xf0]  }
   0x9   :  { %v64_v17 = vsel %vm4_vm0, %v178_v15, %v177_v14  ;;  %s211_s11 = smov 80   ;;  %v85_v23 = vsel %vm4_vm0, %v183_v21, %v182_v20  ;;  %v189_v24 = vld [vmem:[%s388_s0 + $0x43] ss:$8 sm:$0xf]   ;;  %s212_s20 = smov 64   ;;  %vm67_vm4 = vcmask 786048  }
   0xa   :  { %v190_v25 = vld [vmem:[%s388_s0 + $0x43] ss:$8 sm:$0xf0]   ;;  %v194_v28 = vld [vmem:[%s388_s0 + $0x42] ss:$8 sm:$0xf]  }
   0xb   :  { %v187_v26 = vld [vmem:[%s388_s0 + $0x3] ss:$8 sm:$0xf]   ;;  %v195_v29 = vld [vmem:[%s388_s0 + $0x42] ss:$8 sm:$0xf0]   ;;  %v116_v30 = vsel %vm4_vm0, %v190_v25, %v189_v24 }
   0xc   :  { %75 = vrot.lane.b32.xlu1 %v74_v16, %s211_s11  ;;  %65 = vrot.lane.b32.xlu0 %v64_v17, %s211_s11  ;;  %v188_v27 = vld [vmem:[%s388_s0 + $0x3] ss:$8 sm:$0xf0]   ;;  %v192_v31 = vld [vmem:[%s388_s0 + $0x2] ss:$8 sm:$0xf]   ;;  %v137_v40 = vsel %vm4_vm0, %v195_v29, %v194_v28 }
   0xd   :  { %v2_v32 = vld [vmem:[%s388_s0] ss:$8 sm:$0xf]   ;;  %v106_v33 = vsel %vm4_vm0, %v188_v27, %v187_v26  ;;  %v193_v36 = vld [vmem:[%s388_s0 + $0x2] ss:$8 sm:$0xf0]  }
   0xe   :  { %v3_v34 = vld [vmem:[%s388_s0] ss:$8 sm:$0xf0]   ;;  %s213_s8 = smov 48   ;;  %v127_v41 = vsel %vm4_vm0, %v193_v36, %v192_v31  ;;  %s215_s21 = smov 16   ;;  %vm88_vm5 = vcmask 654848  }
   0xf   :  { %v164_v35 = vld [vmem:[%s388_s0 + $0x40] ss:$8 sm:$0xf]   ;;  %v5_v37 = vsel %vm4_vm0, %v3_v34, %v2_v32  ;;  %v199_v42 = vld [vmem:[%s388_s0 + $0x41] ss:$8 sm:$0xf]  }
  0x10   :  { %96 = vrot.lane.b32.xlu1 %v95_v22, %s212_s20  ;;  %86 = vrot.lane.b32.xlu0 %v85_v23, %s212_s20  ;;  %v165_v38 = vld [vmem:[%s388_s0 + $0x40] ss:$8 sm:$0xf0]   ;;  %7 = vst.msk [vmem:[%s389_s1] sm:$0xff] %vm6_vm1, %v5_v37   ;;  %vm109_vm6 = vcmask 523648   ;;  %vm130_vm7 = vcmask 392448  }
  0x11   :  { %v13_v39 = vsel %vm4_vm0, %v165_v38, %v164_v35  ;;  %v200_v43 = vld [vmem:[%s388_s0 + $0x41] ss:$8 sm:$0xf0]   ;;  %vm151_vm8 = vcmask 261248  }
  0x12   :  { %166 = vst.msk [vmem:[%s389_s1 + $0x8] sm:$0xff] %vm6_vm1, %v13_v39   ;;  %v197_v44 = vld [vmem:[%s388_s0 + $0x1] ss:$8 sm:$0xf]   ;;  %v158_v46 = vsel %vm4_vm0, %v200_v43, %v199_v42 }
  0x13   :  { %v198_v45 = vld [vmem:[%s388_s0 + $0x1] ss:$8 sm:$0xf0]   ;;  %s214_s0 = smov 32  }
  0x14   :  { %117 = vrot.lane.b32.xlu1 %v116_v30, %s213_s8  ;;  %107 = vrot.lane.b32.xlu0 %v106_v33, %s213_s8  ;;  %v148_v47 = vsel %vm4_vm0, %v198_v45, %v197_v44 }
  0x18   :  { %138 = vrot.lane.b32.xlu1 %v137_v40, %s214_s0  ;;  %128 = vrot.lane.b32.xlu0 %v127_v41, %s214_s0 }
  0x1c   :  { %159 = vrot.lane.b32.xlu1 %v158_v46, %s215_s21  ;;  %149 = vrot.lane.b32.xlu0 %v148_v47, %s215_s21 }
  0x76   :  { %v45_v48 = vpop.permute.xlu1 %44   ;;  %v24_v49 = vpop.permute.xlu0 %23  }
  0x77   :  { %26 = vst.msk [vmem:[%s389_s1] sm:$0xff] %vm25_vm2, %v24_v49  }
  0x78   :  { %47 = vst.msk [vmem:[%s389_s1] sm:$0xff] %vm46_vm3, %v45_v48  }
  0x7a   :  { %v55_v50 = vpop.permute.xlu1 %54   ;;  %v34_v51 = vpop.permute.xlu0 %33  }
  0x7b   :  { %171 = vst.msk [vmem:[%s389_s1 + $0x8] sm:$0xff] %vm25_vm2, %v34_v51  }
  0x7c   :  { %176 = vst.msk [vmem:[%s389_s1 + $0x8] sm:$0xff] %vm46_vm3, %v55_v50  }
  0x7e   :  { %v76_v52 = vpop.permute.xlu1 %75   ;;  %v66_v53 = vpop.permute.xlu0 %65  }
  0x7f   :  { %181 = vst.msk [vmem:[%s389_s1 + $0x8] sm:$0xff] %vm67_vm4, %v76_v52   ;;  %68 = vst.msk [vmem:[%s389_s1] sm:$0xff] %vm67_vm4, %v66_v53  }
  0x82   :  { %v97_v54 = vpop.permute.xlu1 %96   ;;  %v87_v55 = vpop.permute.xlu0 %86  }
  0x83   :  { %186 = vst.msk [vmem:[%s389_s1 + $0x8] sm:$0xff] %vm88_vm5, %v97_v54   ;;  %89 = vst.msk [vmem:[%s389_s1] sm:$0xff] %vm88_vm5, %v87_v55  }
  0x86   :  { %v118_v56 = vpop.permute.xlu1 %117   ;;  %v108_v57 = vpop.permute.xlu0 %107  }
  0x87   :  { %191 = vst.msk [vmem:[%s389_s1 + $0x8] sm:$0xff] %vm109_vm6, %v118_v56   ;;  %110 = vst.msk [vmem:[%s389_s1] sm:$0xff] %vm109_vm6, %v108_v57  }
  0x8a   :  { %v139_v58 = vpop.permute.xlu1 %138   ;;  %v129_v59 = vpop.permute.xlu0 %128  }
  0x8b   :  { %196 = vst.msk [vmem:[%s389_s1 + $0x8] sm:$0xff] %vm130_vm7, %v139_v58   ;;  %131 = vst.msk [vmem:[%s389_s1] sm:$0xff] %vm130_vm7, %v129_v59  }
  0x8e   :  { %v160_v60 = vpop.permute.xlu1 %159   ;;  %v150_v61 = vpop.permute.xlu0 %149  }
  0x8f   :  { %201 = vst.msk [vmem:[%s389_s1 + $0x8] sm:$0xff] %vm151_vm8, %v160_v60   ;;  %152 = vst.msk [vmem:[%s389_s1] sm:$0xff] %vm151_vm8, %v150_v61  }

// kernel: guided_filter.1
= control target key start
LH: loop header
LB: loop body
LE: loop exit
PB: predicated region body
PF: predicated region fallthrough
CT: control target
= control target key end

     0   :  { %v1309_v3 = vmov 0.0   ;;  %vm48_vm0 = vcmask 130048   ;;  %s1582_s0 = inlined_call_operand.vmem [shape: f32[1,16,128], index: 0, kind: input, shape index: {}]   ;;  %s1583_s1 = inlined_call_operand.vmem [shape: f32[1,16,128], index: 1, kind: input, shape index: {}]   ;;  %s1584_s3 = inlined_call_operand.vmem [shape: f32[128,128], index: 3, kind: input, shape index: {}]   ;;  %s1585_s2 = inlined_call_operand.vmem [shape: f32[16,16], index: 2, kind: input, shape index: {}]   ;;  %s1586_s4 = inlined_call_operand.vmem [shape: f32[16,128], index: 4, kind: input, shape index: {}]   ;;  %s1587_s5 = inlined_call_operand.vmem [shape: f32[1,16,128], index: 5, kind: output, shape index: {}]  }
   0x1   :  { %v1343_v0 = vld [vmem:[%s1582_s0] sm:$0xff]  ;;  %v1348_v1 = vld [vmem:[%s1582_s0 + $0x8] sm:$0xff]  ;;  %119 = vmatprep.mubr.f32.mxu0 %v1309_v3  ;;  %196 = vmatprep.mubr.f32.mxu1 %v1309_v3  ;;  %v28_v16 = vld [vmem:[%s1584_s3 + $0x10] sm:$0xff] }
   0x2   :  { %v22_v2 = vld [vmem:[%s1583_s1] sm:$0xff]  ;;  %v23_v4 = vld [vmem:[%s1583_s1 + $0x8] sm:$0xff]  ;;  %v1102_v6 = vpack.c.bf16 %v1348_v1, %v1343_v0  ;;  %v46_v7 = vmul.f32 %v1343_v0, %v1343_v0  ;;  %v47_v8 = vmul.f32 %v1348_v1, %v1348_v1  ;;  %v29_v17 = vld [vmem:[%s1584_s3 + $0x18] sm:$0xff] }
   0x3   :  { %v44_v5 = vmul.f32 %v22_v2, %v1343_v0  ;;  %v45_v9 = vmul.f32 %v23_v4, %v1348_v1  ;;  %v1100_v10 = vpack.c.bf16 %v23_v4, %v22_v2  ;;  %v26_v11 = vld [vmem:[%s1584_s3] sm:$0xff]  ;;  %v27_v12 = vld [vmem:[%s1584_s3 + $0x8] sm:$0xff]  ;;  %v1387_v19 = vpack.c.bf16 %v29_v17, %v28_v16  ;;  %v32_v24 = vld [vmem:[%s1584_s3 + $0x30] sm:$0xff] }
   0x4   :  { %v1104_v13 = vpack.c.bf16 %v47_v8, %v46_v7  ;;  %v1372_v14 = vpack.c.bf16 %v27_v12, %v26_v11  ;;  %v1383_v18 = vld [vmem:[%s1585_s2] sm:$0xff]  ;;  %v31_v21 = vld [vmem:[%s1584_s3 + $0x28] sm:$0xff]  ;;  %v33_v25 = vld [vmem:[%s1584_s3 + $0x38] sm:$0xff] }
   0x5   :  { %1101 = vmatprep.subr.bf16.mxu0 %v1100_v10  ;;  %v1106_v15 = vpack.c.bf16 %v45_v9, %v44_v5  ;;  %v30_v20 = vld [vmem:[%s1584_s3 + $0x20] sm:$0xff]  ;;  %v1401_v22 = vld [vmem:[%s1585_s2 + $0x8] sm:$0xff]  ;;  %v1425_v26 = vpack.c.bf16 %v33_v25, %v32_v24  ;;  %v36_v30 = vld [vmem:[%s1584_s3 + $0x50] sm:$0xff] }
   0x6   :  { %1103 = vmatpush1.bf16.msra.mxu0 %v1102_v6  ;;  %1105 = vmatprep.subr.bf16.mxu1 %v1104_v13  ;;  %v1409_v23 = vpack.c.bf16 %v31_v21, %v30_v20  ;;  %v34_v27 = vld [vmem:[%s1584_s3 + $0x40] sm:$0xff]  ;;  %v35_v28 = vld [vmem:[%s1584_s3 + $0x48] sm:$0xff]  ;;  %v37_v31 = vld [vmem:[%s1584_s3 + $0x58] sm:$0xff] }
   0x7   :  { %1107 = vmatpush1.bf16.msra.mxu1 %v1106_v15  ;;  %1109 = vmatprep.subr.bf16.mxu0 %v1372_v14  ;;  %v1437_v29 = vpack.c.bf16 %v35_v28, %v34_v27  ;;  %v1449_v32 = vpack.c.bf16 %v37_v31, %v36_v30  ;;  %v38_v33 = vld [vmem:[%s1584_s3 + $0x60] sm:$0xff]  ;;  %v39_v34 = vld [vmem:[%s1584_s3 + $0x68] sm:$0xff]  ;;  %v40_v36 = vld [vmem:[%s1584_s3 + $0x70] sm:$0xff] }
   0x8   :  { %1141 = vmatprep.subr.bf16.mxu1 %v1372_v14  ;;  %v1461_v35 = vpack.c.bf16 %v39_v34, %v38_v33  ;;  %v41_v37 = vld [vmem:[%s1584_s3 + $0x78] sm:$0xff]  ;;  %v1534_v47 = vld [vmem:[%s1586_s4 + $0x8] sm:$0xff]  ;;  %v1539_v48 = vld [vmem:[%s1586_s4] sm:$0xff] }
   0x9   :  { %776 = vmatmul.mubr.msk.f32.vlgmr.msra.gmra.mrb[0].mxu0 %vm48_vm0, %v1383_v18  ;;  %v1476_v38 = vpack.c.bf16 %v41_v37, %v40_v36 }
   0xa   :  { %125 = vmatprep.mubr.f32.mxu0 %v1309_v3  ;;  %778 = vmatmul.mubr.msk.f32.vlgmr.msra.gmra.mrb[0].mxu1 %vm48_vm0, %v1383_v18 }
   0xb   :  { %202 = vmatprep.mubr.f32.mxu1 %v1309_v3  ;;  %1111 = vmatpush3.bf16.msra.mxu0 %v1372_v14 }
   0xc   :  { %1143 = vmatpush3.bf16.msra.mxu1 %v1372_v14  ;;  %1113 = vmatprep.subr.bf16.mxu0 %v1387_v19 }
   0xd   :  { %777 = vmatmul.mubr.msk.f32.gmra.mrb[2].mxu0 %vm48_vm0, %v1401_v22  ;;  %1145 = vmatprep.subr.bf16.mxu1 %v1387_v19 }
   0xe   :  { %779 = vmatmul.mubr.msk.f32.gmra.mrb[2].mxu1 %vm48_vm0, %v1401_v22 }
   0xf   :  { %1115 = vmatpush3.bf16.msra.mxu0 %v1387_v19 }
  0x10   :  { %1147 = vmatpush3.bf16.msra.mxu1 %v1387_v19  ;;  %1117 = vmatprep.subr.bf16.mxu0 %v1409_v23 }
  0x11   :  { %1149 = vmatprep.subr.bf16.mxu1 %v1409_v23 }
  0x13   :  { %1119 = vmatpush3.bf16.msra.mxu0 %v1409_v23 }
  0x14   :  { %1151 = vmatpush3.bf16.msra.mxu1 %v1409_v23  ;;  %1121 = vmatprep.subr.bf16.mxu0 %v1425_v26 }
  0x15   :  { %1153 = vmatprep.subr.bf16.mxu1 %v1425_v26 }
  0x17   :  { %1123 = vmatpush3.bf16.msra.mxu0 %v1425_v26 }
  0x18   :  { %1155 = vmatpush3.bf16.msra.mxu1 %v1425_v26  ;;  %1125 = vmatprep.subr.bf16.mxu0 %v1437_v29 }
  0x19   :  { %1157 = vmatprep.subr.bf16.mxu1 %v1437_v29 }
  0x1b   :  { %1127 = vmatpush3.bf16.msra.mxu0 %v1437_v29 }
  0x1c   :  { %1159 = vmatpush3.bf16.msra.mxu1 %v1437_v29  ;;  %1129 = vmatprep.subr.bf16.mxu0 %v1449_v32 }
  0x1d   :  { %1161 = vmatprep.subr.bf16.mxu1 %v1449_v32 }
  0x1f   :  { %1131 = vmatpush3.bf16.msra.mxu0 %v1449_v32 }
  0x20   :  { %1163 = vmatpush3.bf16.msra.mxu1 %v1449_v32  ;;  %1133 = vmatprep.subr.bf16.mxu0 %v1461_v35 }
  0x21   :  { %1165 = vmatprep.subr.bf16.mxu1 %v1461_v35 }
  0x23   :  { %1135 = vmatpush3.bf16.msra.mxu0 %v1461_v35 }
  0x24   :  { %1167 = vmatpush3.bf16.msra.mxu1 %v1461_v35  ;;  %1137 = vmatprep.subr.bf16.mxu0 %v1476_v38 }
  0x25   :  { %1169 = vmatprep.subr.bf16.mxu1 %v1476_v38 }
  0x27   :  { %1139 = vmatpush3.bf16.msra.mxu0 %v1476_v38 }
  0x28   :  { %1171 = vmatpush3.bf16.msra.mxu1 %v1476_v38  ;;  %1173 = vmatprep.subr.bf16.mxu0 %v1372_v14 }
  0x29   :  { %1205 = vmatprep.subr.bf16.mxu1 %v1372_v14 }
  0xdc   :  { %v121_v39 = vpop.f32.mrb[0].mxu0 }
  0xdd   :  { %v123_v40 = vpop.f32.mrb[1].mxu0  ;;  %922 = vmatprep.mubr.f32.mxu0 %v121_v39  ;;  %v198_v41 = vpop.f32.mrb[0].mxu1 }
  0xde   :  { %957 = vmatprep.mubr.f32.mxu1 %v123_v40  ;;  %v200_v42 = vpop.f32.mrb[1].mxu1 }
  0xe0   :  { %v127_v43 = vpop.f32.mrb[2].mxu0 }
  0xe1   :  { %v129_v44 = vpop.f32.mrb[3].mxu0  ;;  %923 = vmatmul.mubr.f32.vlgmr.msra.gmra.mrb[4].mxu0 %v127_v43  ;;  %v204_v45 = vpop.f32.mrb[2].mxu1 }
  0xe2   :  { %1175 = vmatpush3.bf16.msra.mxu0 %v1372_v14  ;;  %958 = vmatmul.mubr.f32.vlgmr.msra.gmra.mrb[4].mxu1 %v129_v44  ;;  %v206_v46 = vpop.f32.mrb[3].mxu1 }
  0xe3   :  { %1207 = vmatpush3.bf16.msra.mxu1 %v1372_v14  ;;  %1177 = vmatprep.subr.bf16.mxu0 %v1387_v19 }
  0xe4   :  { %1209 = vmatprep.subr.bf16.mxu1 %v1387_v19  ;;  %992 = vmatprep.mubr.f32.mxu0 %v198_v41 }
  0xe5   :  { %1027 = vmatprep.mubr.f32.mxu1 %v200_v42 }
  0xe6   :  { %1179 = vmatpush3.bf16.msra.mxu0 %v1387_v19 }
  0xe7   :  { %1211 = vmatpush3.bf16.msra.mxu1 %v1387_v19  ;;  %1181 = vmatprep.subr.bf16.mxu0 %v1409_v23 }
  0xe8   :  { %1213 = vmatprep.subr.bf16.mxu1 %v1409_v23 }
  0xea   :  { %1183 = vmatpush3.bf16.msra.mxu0 %v1409_v23 }
  0xeb   :  { %1215 = vmatpush3.bf16.msra.mxu1 %v1409_v23  ;;  %1185 = vmatprep.subr.bf16.mxu0 %v1425_v26 }
  0xec   :  { %1217 = vmatprep.subr.bf16.mxu1 %v1425_v26 }
  0xee   :  { %1187 = vmatpush3.bf16.msra.mxu0 %v1425_v26 }
  0xef   :  { %1219 = vmatpush3.bf16.msra.mxu1 %v1425_v26  ;;  %1189 = vmatprep.subr.bf16.mxu0 %v1437_v29 }
  0xf0   :  { %1221 = vmatprep.subr.bf16.mxu1 %v1437_v29 }
  0xf2   :  { %1191 = vmatpush3.bf16.msra.mxu0 %v1437_v29 }
  0xf3   :  { %1223 = vmatpush3.bf16.msra.mxu1 %v1437_v29  ;;  %1193 = vmatprep.subr.bf16.mxu0 %v1449_v32 }
  0xf4   :  { %1225 = vmatprep.subr.bf16.mxu1 %v1449_v32 }
  0xf6   :  { %1195 = vmatpush3.bf16.msra.mxu0 %v1449_v32 }
  0xf7   :  { %1227 = vmatpush3.bf16.msra.mxu1 %v1449_v32  ;;  %1197 = vmatprep.subr.bf16.mxu0 %v1461_v35 }
  0xf8   :  { %1229 = vmatprep.subr.bf16.mxu1 %v1461_v35 }
  0xfa   :  { %1199 = vmatpush3.bf16.msra.mxu0 %v1461_v35 }
  0xfb   :  { %1231 = vmatpush3.bf16.msra.mxu1 %v1461_v35  ;;  %1201 = vmatprep.subr.bf16.mxu0 %v1476_v38 }
  0xfc   :  { %1233 = vmatprep.subr.bf16.mxu1 %v1476_v38 }
  0xfe   :  { %1203 = vmatpush3.bf16.msra.mxu0 %v1476_v38 }
  0xff   :  { %1235 = vmatpush3.bf16.msra.mxu1 %v1476_v38 }
 0x100   :  { %1241 = vmatprep.subr.bf16.mxu1 %v1372_v14 }
 0x101   :  { %993 = vmatmul.mubr.f32.vlgmr.msra.gmra.mrb[6].mxu0 %v204_v45 }
 0x102   :  { %1028 = vmatmul.mubr.f32.vlgmr.msra.gmra.mrb[6].mxu1 %v206_v46  ;;  %599 = vmatprep.mubr.f32.mxu0 %v1309_v3 }
 0x103   :  { %1243 = vmatpush3.bf16.msra.mxu1 %v1372_v14 }
 0x104   :  { %1245 = vmatprep.subr.bf16.mxu1 %v1387_v19 }
 0x107   :  { %1247 = vmatpush3.bf16.msra.mxu1 %v1387_v19 }
 0x108   :  { %1249 = vmatprep.subr.bf16.mxu1 %v1409_v23 }
 0x10b   :  { %1251 = vmatpush3.bf16.msra.mxu1 %v1409_v23 }
 0x10c   :  { %1253 = vmatprep.subr.bf16.mxu1 %v1425_v26 }
 0x10f   :  { %1255 = vmatpush3.bf16.msra.mxu1 %v1425_v26 }
 0x110   :  { %1257 = vmatprep.subr.bf16.mxu1 %v1437_v29 }
 0x113   :  { %1259 = vmatpush3.bf16.msra.mxu1 %v1437_v29 }
 0x114   :  { %1261 = vmatprep.subr.bf16.mxu1 %v1449_v32 }
 0x117   :  { %1263 = vmatpush3.bf16.msra.mxu1 %v1449_v32 }
 0x118   :  { %1265 = vmatprep.subr.bf16.mxu1 %v1461_v35 }
 0x11b   :  { %1267 = vmatpush3.bf16.msra.mxu1 %v1461_v35 }
 0x11c   :  { %1269 = vmatprep.subr.bf16.mxu1 %v1476_v38 }
 0x11f   :  { %1271 = vmatpush3.bf16.msra.mxu1 %v1476_v38 }
 0x1b4   :  { %v924_v49 = vpop.f32.mrb[4].mxu0 }
 0x1b5   :  { %v285_v50 = vmul.f32 %v924_v49, %v1534_v47  ;;  %v275_v51 = vpop.f32.mrb[5].mxu0  ;;  %v959_v52 = vpop.f32.mrb[4].mxu1 }
 0x1b6   :  { %v284_v53 = vmul.f32 %v275_v51, %v1539_v48  ;;  %v362_v54 = vmul.f32 %v959_v52, %v1534_v47  ;;  %v352_v55 = vpop.f32.mrb[5].mxu1 }
 0x1b7   :  { %v361_v56 = vmul.f32 %v352_v55, %v1539_v48  ;;  %v522_v4 = vmul.f32 %v285_v50, %v285_v50 }
 0x1b8   :  { %v518_v57 = vmul.f32 %v362_v54, %v285_v50  ;;  %v521_v8 = vmul.f32 %v284_v53, %v284_v53 }
 0x1b9   :  { %v517_v58 = vmul.f32 %v361_v56, %v284_v53 }
 0x1d4   :  { %v994_v59 = vpop.f32.mrb[6].mxu0 }
 0x1d5   :  { %v439_v60 = vmul.f32 %v994_v59, %v1534_v47  ;;  %v429_v61 = vpop.f32.mrb[7].mxu0  ;;  %v1029_v62 = vpop.f32.mrb[6].mxu1 }
 0x1d6   :  { %v438_v63 = vmul.f32 %v429_v61, %v1539_v48  ;;  %v516_v2 = vmul.f32 %v1029_v62, %v1534_v47  ;;  %v506_v5 = vpop.f32.mrb[7].mxu1 }
 0x1d7   :  { %v520_v6 = vsub.f32 %v439_v60, %v518_v57  ;;  %v515_v7 = vmul.f32 %v506_v5, %v1539_v48 }
 0x1d8   :  { %v519_v9 = vsub.f32 %v438_v63, %v517_v58  ;;  %v524_v10 = vsub.f32 %v516_v2, %v522_v4 }
 0x1d9   :  { %v523_v11 = vsub.f32 %v515_v7, %v521_v8 }
 0x1da   :  { %v526_v12 = vadd.f32 0.01, %v524_v10 }
 0x1db   :  { %v525_v13 = vadd.f32 0.01, %v523_v11 }
 0x1dc   :  { %1305 = vrcp.f32 %v526_v12 }
 0x1dd   :  { %1307 = vrcp.f32 %v525_v13 }
 0x1e6   :  { %v1306_v15 = vpop.eup %1305 }
 0x1e7   :  { %v1308_v16 = vpop.eup %1307  ;;  %v530_v17 = vmul.f32 %v1306_v15, %v520_v6 }
 0x1e8   :  { %v528_v20 = vmul.f32 %v1308_v16, %v519_v9 }
 0x1e9   :  { %v532_v21 = vmul.f32 %v530_v17, %v285_v50 }
 0x1ea   :  { %v531_v24 = vmul.f32 %v528_v20, %v284_v53  ;;  %v1238_v25 = vpack.c.bf16 %v530_v17, %v528_v20 }
 0x1eb   :  { %v534_v27 = vsub.f32 %v362_v54, %v532_v21 }
 0x1ec   :  { %v533_v28 = vsub.f32 %v361_v56, %v531_v24 }
 0x1ee   :  { %v1236_v30 = vpack.c.bf16 %v534_v27, %v533_v28 }
 0x1f0   :  { %1237 = vmatprep.subr.bf16.mxu0 %v1236_v30 }
 0x1f1   :  { %1239 = vmatpush1.bf16.msra.mxu0 %v1238_v25 }
 0x1f2   :  { %1273 = vmatprep.subr.bf16.mxu0 %v1372_v14 }
 0x1f4   :  { %780 = vmatmul.mubr.msk.f32.vlgmr.msra.gmra.mrb[8].mxu0 %vm48_vm0, %v1383_v18 }
 0x1f5   :  { %605 = vmatprep.mubr.f32.mxu0 %v1309_v3  ;;  %1275 = vmatpush3.bf16.msra.mxu0 %v1372_v14 }
 0x1f6   :  { %1277 = vmatprep.subr.bf16.mxu0 %v1387_v19 }
 0x1f8   :  { %781 = vmatmul.mubr.msk.f32.gmra.mrb[10].mxu0 %vm48_vm0, %v1401_v22 }
 0x1f9   :  { %1279 = vmatpush3.bf16.msra.mxu0 %v1387_v19 }
 0x1fa   :  { %1281 = vmatprep.subr.bf16.mxu0 %v1409_v23 }
 0x1fd   :  { %1283 = vmatpush3.bf16.msra.mxu0 %v1409_v23 }
 0x1fe   :  { %1285 = vmatprep.subr.bf16.mxu0 %v1425_v26 }
 0x201   :  { %1287 = vmatpush3.bf16.msra.mxu0 %v1425_v26 }
 0x202   :  { %1289 = vmatprep.subr.bf16.mxu0 %v1437_v29 }
 0x205   :  { %1291 = vmatpush3.bf16.msra.mxu0 %v1437_v29 }
 0x206   :  { %1293 = vmatprep.subr.bf16.mxu0 %v1449_v32 }
 0x209   :  { %1295 = vmatpush3.bf16.msra.mxu0 %v1449_v32 }
 0x20a   :  { %1297 = vmatprep.subr.bf16.mxu0 %v1461_v35 }
 0x20d   :  { %1299 = vmatpush3.bf16.msra.mxu0 %v1461_v35 }
 0x20e   :  { %1301 = vmatprep.subr.bf16.mxu0 %v1476_v38 }
 0x211   :  { %1303 = vmatpush3.bf16.msra.mxu0 %v1476_v38 }
 0x2c7   :  { %v601_v3 = vpop.f32.mrb[8].mxu0 }
 0x2c8   :  { %v603_v14 = vpop.f32.mrb[9].mxu0  ;;  %1062 = vmatprep.mubr.f32.mxu1 %v601_v3 }
 0x2c9   :  { %1097 = vmatprep.mubr.f32.mxu0 %v603_v14 }
 0x2cb   :  { %v607_v18 = vpop.f32.mrb[10].mxu0 }
 0x2cc   :  { %v609_v19 = vpop.f32.mrb[11].mxu0  ;;  %1063 = vmatmul.mubr.f32.vlgmr.msra.gmra.mrb[8].mxu1 %v607_v18 }
 0x2cd   :  { %1098 = vmatmul.mubr.f32.vlgmr.msra.gmra.mrb[12].mxu0 %v609_v19 }
 0x39f   :  { %v1064_v22 = vpop.f32.mrb[8].mxu1 }
 0x3a0   :  { %v688_v23 = vmul.f32 %v1064_v22, %v1534_v47  ;;  %v678_v26 = vpop.f32.mrb[9].mxu1  ;;  %v1099_v29 = vpop.f32.mrb[12].mxu0 }
 0x3a1   :  { %v687_v31 = vmul.f32 %v678_v26, %v1539_v48  ;;  %v765_v32 = vmul.f32 %v1099_v29, %v1534_v47  ;;  %v755_v33 = vpop.f32.mrb[13].mxu0 }
 0x3a2   :  { %v767_v34 = vmul.f32 %v688_v23, %v1348_v1  ;;  %v764_v35 = vmul.f32 %v755_v33, %v1539_v48 }
 0x3a3   :  { %v766_v36 = vmul.f32 %v687_v31, %v1343_v0 }
 0x3a4   :  { %v769_v37 = vadd.f32 %v767_v34, %v765_v32 }
 0x3a5   :  { %v768_v38 = vadd.f32 %v766_v36, %v764_v35 }
 0x3a6   :  { %771 = vst [vmem:[%s1587_s5 + $0x8] sm:$0xff] %v769_v37 }
 0x3a7   :  { %770 = vst [vmem:[%s1587_s5] sm:$0xff] %v768_v38 }

</bundles_post_ra>
